<compile_context>
chip_gen: v7x
topology: tpu7x:2x2x1
jax: 0.10.0
libtpu: 0.0.40
codegen_flags: <defaults>
</compile_context>

<pallas_src>
import functools

import jax
import jax.numpy as jnp
from jax.experimental import pallas as pl
from jax.experimental.pallas import tpu as pltpu


def _round_up(x, m):
    return (x + m - 1) // m * m


def _cdiv(a, b):
    return -(-a // b)


def _softplus(x):
    # numerically stable softplus, matches torch.nn.functional.softplus
    return jnp.maximum(x, 0.0) + jnp.log1p(jnp.exp(-jnp.abs(x)))


def planner_kernel(x_ref,
                   w1_ref, b1_ref,
                   w2_ref, b2_ref, w3_ref, b3_ref, w4_ref, b4_ref,
                   wh_ref, bh_ref,
                   mu_ref, sigma_ref, *, epsilon, latent_pad):
    # Weights may be bf16; activations are kept f32 and only down-cast at the
    # MXU operand boundary (v5e VPU/EUP have no bf16 support).
    wdt = w1_ref.dtype

    # fc1: single [tile_b, in_dim] @ [in_dim, h_pad] matmul (concat was done
    # once in the wrapper -- in_dim is tiny, no meaningful HBM round trip).
    h = jnp.dot(x_ref[...].astype(wdt), w1_ref[...],
                preferred_element_type=jnp.float32) + b1_ref[...]
    h = jnp.maximum(h, 0.0)

    # fc2..fc4 (unrolled at trace time)
    for w_ref, b_ref in ((w2_ref, b2_ref), (w3_ref, b3_ref), (w4_ref, b4_ref)):
        h = jnp.dot(h.astype(wdt), w_ref[...],
                    preferred_element_type=jnp.float32) + b_ref[...]
        h = jnp.maximum(h, 0.0)

    # fused heads: one lane-dense [tile_b, 2*latent_pad] matmul
    head = jnp.dot(h.astype(wdt), wh_ref[...],
                   preferred_element_type=jnp.float32) + bh_ref[...]

    mu_ref[...] = head[:, :latent_pad].astype(mu_ref.dtype)
    sigma_ref[...] = (_softplus(head[:, latent_pad:]) + epsilon).astype(sigma_ref.dtype)


def planner_forward(obs_init, obs_goal, params, *, epsilon=1e-4,
                    weight_dtype=jnp.bfloat16, out_dtype=jnp.float32,
                    tile_b=256):
    """Pallas-fused forward pass of the Planner MLP.

    params: dict with keys fc1..fc4, mu, sigma; each maps to (W[in,out], b[1,out]).
    """
    obs_init = obs_init.astype(jnp.float32)
    obs_goal = obs_goal.astype(jnp.float32)
    batch, obs_dim = obs_init.shape
    goal_dim = obs_goal.shape[1]
    in_dim = obs_dim + goal_dim
    hidden = params["fc2"][0].shape[0]
    latent = params["mu"][0].shape[1]

    h_pad = _round_up(hidden, 128)
    l_pad = _round_up(latent, 128)

    # Concat once in the wrapper (tiny: in_dim floats per row) so fc1 is one
    # matmul with a single MXU weight push per grid step.
    x = jnp.concatenate([obs_init, obs_goal], axis=-1)

    def pad_to(a, shape):
        pads = [(0, s - d) for d, s in zip(a.shape, shape)]
        return jnp.pad(a, pads) if any(p for _, p in pads) else a

    def w_cast(w, shape):
        return pad_to(w.astype(jnp.float32), shape).astype(weight_dtype)

    def b_cast(b, width):
        return pad_to(b.astype(jnp.float32).reshape(1, -1), (1, width))

    w1p = w_cast(params["fc1"][0], (in_dim, h_pad))
    b1p = b_cast(params["fc1"][1], h_pad)
    w2p = w_cast(params["fc2"][0], (h_pad, h_pad)); b2p = b_cast(params["fc2"][1], h_pad)
    w3p = w_cast(params["fc3"][0], (h_pad, h_pad)); b3p = b_cast(params["fc3"][1], h_pad)
    w4p = w_cast(params["fc4"][0], (h_pad, h_pad)); b4p = b_cast(params["fc4"][1], h_pad)

    # fused mu|sigma head: [h_pad, 2*l_pad] weight, [1, 2*l_pad] bias.
    wmu = pad_to(params["mu"][0].astype(jnp.float32), (h_pad, l_pad))
    wsig = pad_to(params["sigma"][0].astype(jnp.float32), (h_pad, l_pad))
    whp = jnp.concatenate([wmu, wsig], axis=1).astype(weight_dtype)
    bhp = jnp.concatenate([b_cast(params["mu"][1], l_pad),
                           b_cast(params["sigma"][1], l_pad)], axis=1)

    flat = (w1p, b1p, w2p, b2p, w3p, b3p, w4p, b4p, whp, bhp)
    weight_bytes = sum(int(a.size) * a.dtype.itemsize for a in flat)
    out_itemsize = jnp.dtype(out_dtype).itemsize

    # Actual per-core VMEM capacity (v7x = 64 MiB, v5e/v6e = 128 MiB).
    try:
        vmem_cap = int(pltpu.get_tpu_info().vmem_capacity_bytes)
    except Exception:
        vmem_cap = 64 * 1024 * 1024  # conservative (v7x) fallback
    vmem_budget = int(0.85 * vmem_cap)

    def vmem_need(tb):
        # weights: single-buffered (memory_space=VMEM whole-array inputs)
        io = 2 * tb * in_dim * 4 + 2 * 2 * tb * l_pad * out_itemsize  # pipelined x / outputs
        act = 6 * tb * h_pad * 4                                      # live f32 temporaries
        return weight_bytes + io + act

    # Balanced batch tiling: tiles of ceil(batch/n_tiles) rounded to 8 rows
    # (padding waste < 8*n_tiles instead of up to tile_b-1). Use >=2 tiles
    # whenever the batch allows so the "parallel" axis feeds both v7x TCs.
    tile_cap = max(8, _round_up(min(int(tile_b), 512), 8))
    n_tiles = max(1, _cdiv(batch, tile_cap))
    if batch >= 16:
        n_tiles = max(n_tiles, 2)
    max_tiles = max(1, _cdiv(batch, 8))
    while True:
        tb = max(8, _round_up(_cdiv(batch, n_tiles), 8))
        if vmem_need(tb) <= vmem_budget or n_tiles >= max_tiles:
            tile_b = tb
            break
        n_tiles = min(max_tiles, n_tiles * 2)
    b_pad = n_tiles * tile_b
    if b_pad != batch:
        x = jnp.pad(x, ((0, b_pad - batch), (0, 0)))

    need = vmem_need(tile_b)
    # Always pass an explicit scoped-VMEM limit (v5e default is only 16 MiB),
    # capped at 90% of the device's physical VMEM (never a hard-coded 96 MiB).
    vmem_limit = min(max(int(need * 1.5), 32 * 1024 * 1024), int(0.9 * vmem_cap))
    # TODO(synk): if `need` still exceeds the budget at tile_b=8 (very large
    # layer_size on v7x's 64 MiB VMEM), stream W2..W4 / head tiles over an
    # inner grid axis with a pl.when-initialized f32 accumulator instead of
    # keeping all weights resident.

    def resident():
        # Whole-array VMEM placement: single-buffered, loaded once, resident
        # across all grid steps (no 2x pipeline double-buffering of weights).
        return pl.BlockSpec(memory_space=pltpu.MemorySpace.VMEM)

    in_specs = [pl.BlockSpec((tile_b, in_dim), lambda i: (i, 0))] + \
               [resident() for _ in flat]
    out_specs = (
        pl.BlockSpec((tile_b, l_pad), lambda i: (i, 0)),
        pl.BlockSpec((tile_b, l_pad), lambda i: (i, 0)),
    )

    mu_p, sigma_p = pl.pallas_call(
        functools.partial(planner_kernel, epsilon=epsilon, latent_pad=l_pad),
        out_shape=(
            jax.ShapeDtypeStruct((b_pad, l_pad), out_dtype),
            jax.ShapeDtypeStruct((b_pad, l_pad), out_dtype),
        ),
        grid_spec=pltpu.PrefetchScalarGridSpec(
            num_scalar_prefetch=0,
            grid=(n_tiles,),
            in_specs=in_specs,
            out_specs=out_specs,
        ),
        compiler_params=pltpu.CompilerParams(
            dimension_semantics=("parallel",),
            vmem_limit_bytes=vmem_limit,
        ),
    )(x, *flat)

    return mu_p[:batch, :latent], sigma_p[:batch, :latent]


def init_params(key, input_dim, layer_size, latent_dim):
    """Deterministic init matching nn.Linear default (uniform +-1/sqrt(fan_in))."""
    dims = [
        ("fc1", input_dim, layer_size),
        ("fc2", layer_size, layer_size),
        ("fc3", layer_size, layer_size),
        ("fc4", layer_size, layer_size),
        ("mu", layer_size, latent_dim),
        ("sigma", layer_size, latent_dim),
    ]
    params = {}
    for name, fan_in, fan_out in dims:
        key, kw, kb = jax.random.split(key, 3)
        bound = 1.0 / jnp.sqrt(jnp.float32(fan_in))
        w = jax.random.uniform(kw, (fan_in, fan_out), jnp.float32, -bound, bound)
        b = jax.random.uniform(kb, (1, fan_out), jnp.float32, -bound, bound)
        params[name] = (w, b)
    return params


def planner_reference(obs_init, obs_goal, params, *, epsilon=1e-4):
    x = jnp.concatenate([obs_init, obs_goal], axis=-1)
    for name in ("fc1", "fc2", "fc3", "fc4"):
        w, b = params[name]
        x = jax.nn.relu(x @ w + b)
    mu = x @ params["mu"][0] + params["mu"][1]
    sigma = jax.nn.softplus(x @ params["sigma"][0] + params["sigma"][1]) + epsilon
    return mu, sigma


if __name__ == "__main__":
    # Small shapes consistent with the module's forward.
    batch = 8
    obs_dim = 16
    goal_dim = 16
    layer_size = 256
    latent_dim = 128
    epsilon = 1e-4

    key = jax.random.PRNGKey(0)
    k_obs, k_goal, k_params = jax.random.split(key, 3)

    obs_init = jax.random.normal(k_obs, (batch, obs_dim), jnp.float32)
    obs_goal = jax.random.normal(k_goal, (batch, goal_dim), jnp.float32)
    params = init_params(k_params, obs_dim + goal_dim, layer_size, latent_dim)

    mu_ref, sigma_ref = planner_reference(obs_init, obs_goal, params, epsilon=epsilon)

    # f32-weight path: exact-semantics check against the pure-JAX reference.
    mu32, sig32 = planner_forward(obs_init, obs_goal, params, epsilon=epsilon,
                                  weight_dtype=jnp.float32)
    jax.block_until_ready((mu32, sig32))
    assert mu32.shape == (batch, latent_dim) and sig32.shape == (batch, latent_dim)
    assert jnp.allclose(mu32, mu_ref, atol=2e-4, rtol=2e-4)
    assert jnp.allclose(sig32, sigma_ref, atol=2e-4, rtol=2e-4)

    # bf16-weight path (default, halves weight footprint): loose check vs f32 ref.
    mu16, sig16 = planner_forward(obs_init, obs_goal, params, epsilon=epsilon,
                                  weight_dtype=jnp.bfloat16)
    jax.block_until_ready((mu16, sig16))
    assert jnp.allclose(mu16, mu_ref, atol=1e-1, rtol=1e-1)
    assert jnp.allclose(sig16, sigma_ref, atol=1e-1, rtol=1e-1)

    print("KERNEL_OK")
</pallas_src>

<mosaic_0001>
module attributes {stable_mosaic.version = 11 : i64} {
  func.func @planner_kernel(%arg0: i32, %arg1: memref<8x32xf32, #tpu.memory_space<vmem>>, %arg2: memref<32x256xf32, #tpu.memory_space<vmem>>, %arg3: memref<1x256xf32, #tpu.memory_space<vmem>>, %arg4: memref<256x256xf32, #tpu.memory_space<vmem>>, %arg5: memref<1x256xf32, #tpu.memory_space<vmem>>, %arg6: memref<256x256xf32, #tpu.memory_space<vmem>>, %arg7: memref<1x256xf32, #tpu.memory_space<vmem>>, %arg8: memref<256x256xf32, #tpu.memory_space<vmem>>, %arg9: memref<1x256xf32, #tpu.memory_space<vmem>>, %arg10: memref<256x256xf32, #tpu.memory_space<vmem>>, %arg11: memref<1x256xf32, #tpu.memory_space<vmem>>, %arg12: memref<8x128xf32, #tpu.memory_space<vmem>>, %arg13: memref<8x128xf32, #tpu.memory_space<vmem>>) attributes {dimension_semantics = [#tpu.dimension_semantics<parallel>], iteration_bounds = array<i64: 1>, scalar_prefetch = 0 : i64, scratch_operands = 0 : i64, tpu.core_type = #tpu.core_type<tc>, window_params = [{transform_indices = @transform_0, window_bounds = array<i64: 8, 32>}, {pipeline_mode = #tpu.pipeline_mode<synchronous>, transform_indices = @transform_1, window_bounds = array<i64: 32, 256>}, {pipeline_mode = #tpu.pipeline_mode<synchronous>, transform_indices = @transform_2, window_bounds = array<i64: 1, 256>}, {pipeline_mode = #tpu.pipeline_mode<synchronous>, transform_indices = @transform_3, window_bounds = array<i64: 256, 256>}, {pipeline_mode = #tpu.pipeline_mode<synchronous>, transform_indices = @transform_4, window_bounds = array<i64: 1, 256>}, {pipeline_mode = #tpu.pipeline_mode<synchronous>, transform_indices = @transform_5, window_bounds = array<i64: 256, 256>}, {pipeline_mode = #tpu.pipeline_mode<synchronous>, transform_indices = @transform_6, window_bounds = array<i64: 1, 256>}, {pipeline_mode = #tpu.pipeline_mode<synchronous>, transform_indices = @transform_7, window_bounds = array<i64: 256, 256>}, {pipeline_mode = #tpu.pipeline_mode<synchronous>, transform_indices = @transform_8, window_bounds = array<i64: 1, 256>}, {pipeline_mode = #tpu.pipeline_mode<synchronous>, transform_indices = @transform_9, window_bounds = array<i64: 256, 256>}, {pipeline_mode = #tpu.pipeline_mode<synchronous>, transform_indices = @transform_10, window_bounds = array<i64: 1, 256>}, {transform_indices = @transform_11, window_bounds = array<i64: 8, 128>}, {transform_indices = @transform_12, window_bounds = array<i64: 8, 128>}]} {
    %c0 = arith.constant 0 : index
    %c0_0 = arith.constant 0 : index
    %0 = vector.load %arg1[%c0, %c0_0] : memref<8x32xf32, #tpu.memory_space<vmem>>, vector<8x32xf32>
    %c0_1 = arith.constant 0 : index
    %c0_2 = arith.constant 0 : index
    %1 = vector.load %arg2[%c0_1, %c0_2] : memref<32x256xf32, #tpu.memory_space<vmem>>, vector<32x256xf32>
    %cst = arith.constant dense<0.000000e+00> : vector<8x256xf32>
    %2 = tpu.matmul %0, %1, %cst {dimension_numbers = #tpu.dot_dimension_numbers<[1], [0], [0], [1], [0, 0, 1, 1], [], []>} : vector<8x32xf32>, vector<32x256xf32>, vector<8x256xf32> -> vector<8x256xf32>
    %c0_3 = arith.constant 0 : index
    %c0_4 = arith.constant 0 : index
    %3 = vector.load %arg3[%c0_3, %c0_4] : memref<1x256xf32, #tpu.memory_space<vmem>>, vector<1x256xf32>
    %4 = vector.broadcast %3 : vector<1x256xf32> to vector<8x256xf32>
    %5 = arith.addf %2, %4 : vector<8x256xf32>
    %cst_5 = arith.constant 0.000000e+00 : f32
    %6 = vector.broadcast %cst_5 : f32 to vector<8x256xf32>
    %7 = arith.maximumf %5, %6 : vector<8x256xf32>
    %c0_6 = arith.constant 0 : index
    %c0_7 = arith.constant 0 : index
    %8 = vector.load %arg4[%c0_6, %c0_7] : memref<256x256xf32, #tpu.memory_space<vmem>>, vector<256x256xf32>
    %cst_8 = arith.constant dense<0.000000e+00> : vector<8x256xf32>
    %9 = tpu.matmul %7, %8, %cst_8 {dimension_numbers = #tpu.dot_dimension_numbers<[1], [0], [0], [1], [0, 0, 1, 1], [], []>} : vector<8x256xf32>, vector<256x256xf32>, vector<8x256xf32> -> vector<8x256xf32>
    %c0_9 = arith.constant 0 : index
    %c0_10 = arith.constant 0 : index
    %10 = vector.load %arg5[%c0_9, %c0_10] : memref<1x256xf32, #tpu.memory_space<vmem>>, vector<1x256xf32>
    %11 = vector.broadcast %10 : vector<1x256xf32> to vector<8x256xf32>
    %12 = arith.addf %9, %11 : vector<8x256xf32>
    %cst_11 = arith.constant 0.000000e+00 : f32
    %13 = vector.broadcast %cst_11 : f32 to vector<8x256xf32>
    %14 = arith.maximumf %12, %13 : vector<8x256xf32>
    %c0_12 = arith.constant 0 : index
    %c0_13 = arith.constant 0 : index
    %15 = vector.load %arg6[%c0_12, %c0_13] : memref<256x256xf32, #tpu.memory_space<vmem>>, vector<256x256xf32>
    %cst_14 = arith.constant dense<0.000000e+00> : vector<8x256xf32>
    %16 = tpu.matmul %14, %15, %cst_14 {dimension_numbers = #tpu.dot_dimension_numbers<[1], [0], [0], [1], [0, 0, 1, 1], [], []>} : vector<8x256xf32>, vector<256x256xf32>, vector<8x256xf32> -> vector<8x256xf32>
    %c0_15 = arith.constant 0 : index
    %c0_16 = arith.constant 0 : index
    %17 = vector.load %arg7[%c0_15, %c0_16] : memref<1x256xf32, #tpu.memory_space<vmem>>, vector<1x256xf32>
    %18 = vector.broadcast %17 : vector<1x256xf32> to vector<8x256xf32>
    %19 = arith.addf %16, %18 : vector<8x256xf32>
    %cst_17 = arith.constant 0.000000e+00 : f32
    %20 = vector.broadcast %cst_17 : f32 to vector<8x256xf32>
    %21 = arith.maximumf %19, %20 : vector<8x256xf32>
    %c0_18 = arith.constant 0 : index
    %c0_19 = arith.constant 0 : index
    %22 = vector.load %arg8[%c0_18, %c0_19] : memref<256x256xf32, #tpu.memory_space<vmem>>, vector<256x256xf32>
    %cst_20 = arith.constant dense<0.000000e+00> : vector<8x256xf32>
    %23 = tpu.matmul %21, %22, %cst_20 {dimension_numbers = #tpu.dot_dimension_numbers<[1], [0], [0], [1], [0, 0, 1, 1], [], []>} : vector<8x256xf32>, vector<256x256xf32>, vector<8x256xf32> -> vector<8x256xf32>
    %c0_21 = arith.constant 0 : index
    %c0_22 = arith.constant 0 : index
    %24 = vector.load %arg9[%c0_21, %c0_22] : memref<1x256xf32, #tpu.memory_space<vmem>>, vector<1x256xf32>
    %25 = vector.broadcast %24 : vector<1x256xf32> to vector<8x256xf32>
    %26 = arith.addf %23, %25 : vector<8x256xf32>
    %cst_23 = arith.constant 0.000000e+00 : f32
    %27 = vector.broadcast %cst_23 : f32 to vector<8x256xf32>
    %28 = arith.maximumf %26, %27 : vector<8x256xf32>
    %c0_24 = arith.constant 0 : index
    %c0_25 = arith.constant 0 : index
    %29 = vector.load %arg10[%c0_24, %c0_25] : memref<256x256xf32, #tpu.memory_space<vmem>>, vector<256x256xf32>
    %cst_26 = arith.constant dense<0.000000e+00> : vector<8x256xf32>
    %30 = tpu.matmul %28, %29, %cst_26 {dimension_numbers = #tpu.dot_dimension_numbers<[1], [0], [0], [1], [0, 0, 1, 1], [], []>} : vector<8x256xf32>, vector<256x256xf32>, vector<8x256xf32> -> vector<8x256xf32>
    %c0_27 = arith.constant 0 : index
    %c0_28 = arith.constant 0 : index
    %31 = vector.load %arg11[%c0_27, %c0_28] : memref<1x256xf32, #tpu.memory_space<vmem>>, vector<1x256xf32>
    %32 = vector.broadcast %31 : vector<1x256xf32> to vector<8x256xf32>
    %33 = arith.addf %30, %32 : vector<8x256xf32>
    %34 = vector.extract_strided_slice %33 {offsets = [0, 0], sizes = [8, 128], strides = [1, 1]} : vector<8x256xf32> to vector<8x128xf32>
    %c0_29 = arith.constant 0 : index
    %c0_30 = arith.constant 0 : index
    %35 = vector.load %arg12[%c0_29, %c0_30] : memref<8x128xf32, #tpu.memory_space<vmem>>, vector<8x128xf32>
    tpu.vector_store %arg12[%c0_29, %c0_30], %34 {strides = array<i32>} : memref<8x128xf32, #tpu.memory_space<vmem>>, vector<8x128xf32>,
    %36 = vector.extract_strided_slice %33 {offsets = [0, 128], sizes = [8, 128], strides = [1, 1]} : vector<8x256xf32> to vector<8x128xf32>
    %cst_31 = arith.constant 0.000000e+00 : f32
    %37 = vector.broadcast %cst_31 : f32 to vector<8x128xf32>
    %38 = arith.maximumf %36, %37 : vector<8x128xf32>
    %39 = math.absf %36 : vector<8x128xf32>
    %cst_32 = arith.constant 0.000000e+00 : f32
    %40 = vector.broadcast %cst_32 : f32 to vector<8x128xf32>
    %41 = arith.subf %40, %39 : vector<8x128xf32>
    %42 = math.exp %41 : vector<8x128xf32>
    %43 = math.log1p %42 : vector<8x128xf32>
    %44 = arith.addf %38, %43 : vector<8x128xf32>
    %cst_33 = arith.constant 9.99999974E-5 : f32
    %45 = vector.broadcast %cst_33 : f32 to vector<8x128xf32>
    %46 = arith.addf %44, %45 : vector<8x128xf32>
    %c0_34 = arith.constant 0 : index
    %c0_35 = arith.constant 0 : index
    %47 = vector.load %arg13[%c0_34, %c0_35] : memref<8x128xf32, #tpu.memory_space<vmem>>, vector<8x128xf32>
    tpu.vector_store %arg13[%c0_34, %c0_35], %46 {strides = array<i32>} : memref<8x128xf32, #tpu.memory_space<vmem>>, vector<8x128xf32>,
    return
  }
  func.func @transform_0(%arg0: i32) -> (i32, i32) {
    %c0_i32 = arith.constant 0 : i32
    %c0_i32_0 = arith.constant 0 : i32
    return %arg0, %c0_i32 : i32, i32
  }
  func.func @transform_1(%arg0: i32) -> (i32, i32) {
    %c0_i32 = arith.constant 0 : i32
    %c0_i32_0 = arith.constant 0 : i32
    %c0_i32_1 = arith.constant 0 : i32
    return %c0_i32, %c0_i32_0 : i32, i32
  }
  func.func @transform_2(%arg0: i32) -> (i32, i32) {
    %c0_i32 = arith.constant 0 : i32
    %c0_i32_0 = arith.constant 0 : i32
    %c0_i32_1 = arith.constant 0 : i32
    return %c0_i32, %c0_i32_0 : i32, i32
  }
  func.func @transform_3(%arg0: i32) -> (i32, i32) {
    %c0_i32 = arith.constant 0 : i32
    %c0_i32_0 = arith.constant 0 : i32
    %c0_i32_1 = arith.constant 0 : i32
    return %c0_i32, %c0_i32_0 : i32, i32
  }
  func.func @transform_4(%arg0: i32) -> (i32, i32) {
    %c0_i32 = arith.constant 0 : i32
    %c0_i32_0 = arith.constant 0 : i32
    %c0_i32_1 = arith.constant 0 : i32
    return %c0_i32, %c0_i32_0 : i32, i32
  }
  func.func @transform_5(%arg0: i32) -> (i32, i32) {
    %c0_i32 = arith.constant 0 : i32
    %c0_i32_0 = arith.constant 0 : i32
    %c0_i32_1 = arith.constant 0 : i32
    return %c0_i32, %c0_i32_0 : i32, i32
  }
  func.func @transform_6(%arg0: i32) -> (i32, i32) {
    %c0_i32 = arith.constant 0 : i32
    %c0_i32_0 = arith.constant 0 : i32
    %c0_i32_1 = arith.constant 0 : i32
    return %c0_i32, %c0_i32_0 : i32, i32
  }
  func.func @transform_7(%arg0: i32) -> (i32, i32) {
    %c0_i32 = arith.constant 0 : i32
    %c0_i32_0 = arith.constant 0 : i32
    %c0_i32_1 = arith.constant 0 : i32
    return %c0_i32, %c0_i32_0 : i32, i32
  }
  func.func @transform_8(%arg0: i32) -> (i32, i32) {
    %c0_i32 = arith.constant 0 : i32
    %c0_i32_0 = arith.constant 0 : i32
    %c0_i32_1 = arith.constant 0 : i32
    return %c0_i32, %c0_i32_0 : i32, i32
  }
  func.func @transform_9(%arg0: i32) -> (i32, i32) {
    %c0_i32 = arith.constant 0 : i32
    %c0_i32_0 = arith.constant 0 : i32
    %c0_i32_1 = arith.constant 0 : i32
    return %c0_i32, %c0_i32_0 : i32, i32
  }
  func.func @transform_10(%arg0: i32) -> (i32, i32) {
    %c0_i32 = arith.constant 0 : i32
    %c0_i32_0 = arith.constant 0 : i32
    %c0_i32_1 = arith.constant 0 : i32
    return %c0_i32, %c0_i32_0 : i32, i32
  }
  func.func @transform_11(%arg0: i32) -> (i32, i32) {
    %c0_i32 = arith.constant 0 : i32
    %c0_i32_0 = arith.constant 0 : i32
    return %arg0, %c0_i32 : i32, i32
  }
  func.func @transform_12(%arg0: i32) -> (i32, i32) {
    %c0_i32 = arith.constant 0 : i32
    %c0_i32_0 = arith.constant 0 : i32
    return %arg0, %c0_i32 : i32, i32
  }
}

</mosaic_0001>

<bundles_post_ra>
// kernel: tpu_custom_call.1
= control target key start
LH: loop header
LB: loop body
LE: loop exit
PB: predicated region body
PF: predicated region fallthrough
CT: control target
= control target key end

     0   :  { %18 = vsyncpa [#allocation3], 0  ;;  %s1548_s0 = inlined_call_operand.hbm [shape: f32[8,32], index: 0, kind: input, shape index: {}]   ;;  %s1549_s1 = inlined_call_operand.hbm [shape: f32[32,256], index: 1, kind: input, shape index: {}]   ;;  %s1550_s2 = inlined_call_operand.vmem [shape: f32[1,256], index: 2, kind: input, shape index: {}]   ;;  %s1551_s3 = inlined_call_operand.hbm [shape: f32[256,256], index: 3, kind: input, shape index: {}]   ;;  %s1552_s4 = inlined_call_operand.vmem [shape: f32[1,256], index: 4, kind: input, shape index: {}]   ;;  %s1553_s5 = inlined_call_operand.hbm [shape: f32[256,256], index: 5, kind: input, shape index: {}]   ;;  %s1554_s6 = inlined_call_operand.vmem [shape: f32[1,256], index: 6, kind: input, shape index: {}]   ;;  %s1555_s7 = inlined_call_operand.hbm [shape: f32[256,256], index: 7, kind: input, shape index: {}]   ;;  %s1556_s8 = inlined_call_operand.vmem [shape: f32[1,256], index: 8, kind: input, shape index: {}]   ;;  %s1557_s9 = inlined_call_operand.hbm [shape: f32[256,256], index: 9, kind: input, shape index: {}]   ;;  %s1558_s10 = inlined_call_operand.vmem [shape: f32[1,256], index: 10, kind: input, shape index: {}]   ;;  %s1559_s11 = inlined_call_operand.hbm [shape: f32[8,128], index: 11, kind: output, shape index: {0}]   ;;  %s1560_s12 = inlined_call_operand.hbm [shape: f32[8,128], index: 12, kind: output, shape index: {1}]  }
   0x1   :  { %19 = vsyncpa [#allocation6], 0 }
   0x2   :  { %20 = vsyncpa [#allocation9], 0 }
   0x3   :  { %21 = vsyncpa [#allocation12], 0 }
   0x4   :  { %22 = vsyncpa [#allocation4], 0 }
   0x5   :  { %23 = vsyncpa [#allocation15], 0  ;;  %s1332_s21 = smov [#allocation5]   ;;  %s1144_s25 = scalar_lea.hbm %s1549_s1, 1024 }
   0x6   :  { %s39_s22 = sshll.u32 %s1332_s21, 4  ;;  %p1145_p0 = scmp.ne.s32.totalorder %s1549_s1, %s1144_s25  ;;  %s40_s22 = int_to_ptr.vmem [resolvable:$true] %s39_s22 }
   0x7   :  { %p1148_p1 = scmp.lt.u32.totalorder %s1144_s25, %s1549_s1 }
   0x9   :  { %p1150_p2 = pnand %p1148_p1, %p1145_p0 }
   0xb   :  { %1153 = shalt.err (!%p1150_p2)
}
   0xc   :  { %s1154_s30 = scalar_lea.vmem %s40_s22, 1024  ;;  %p1159_p4 = scmp.lt.s32.totalorder %s40_s22, %s40_s22 }
   0xd   :  { %p1155_p3 = scmp.ne.s32.totalorder %s40_s22, %s1154_s30  ;;  %p1160_p5 = scmp.lt.s32.totalorder %s1154_s30, %s1154_s30 }
   0xf   :  { %p1161_p6 = por %p1160_p5, %p1159_p4 }
  0x11   :  { %p1162_p7 = pnand %p1161_p6, %p1155_p3 }
  0x13   :  { %1165 = shalt.err (!%p1162_p7)
}
  0x14   :  { %s1333_s13 = smov 256   ;;  %s1334_s14 = smov 16  }
  0x15   :  { %45 = dma.hbm_to_vmem [thread:$0]  %s1549_s1, 1024, %s40_s22, [#allocation6], %s1333_s13, %s1333_s13, %s1334_s14  }
  0x16   :  { %s1335_s17 = smov [#allocation8]   ;;  %s1336_s19 = smov [#allocation2]  }
  0x17   :  { %s67_s18 = sshll.u32 %s1335_s17, 4  ;;  %s30_s20 = sshll.u32 %s1336_s19, 4  ;;  %s68_s18 = int_to_ptr.vmem [resolvable:$true] %s67_s18  ;;  %s31_s20 = int_to_ptr.vmem [resolvable:$true] %s30_s20 }
  0x18   :  { %s1166_s24 = scalar_lea.hbm %s1553_s5, 8192 }
  0x19   :  { %p1167_p8 = scmp.ne.s32.totalorder %s1553_s5, %s1166_s24  ;;  %p1170_p9 = scmp.lt.u32.totalorder %s1166_s24, %s1553_s5 }
  0x1b   :  { %p1172_p10 = pnand %p1170_p9, %p1167_p8 }
  0x1d   :  { %1175 = shalt.err (!%p1172_p10)
}
  0x1e   :  { %s1176_s1 = scalar_lea.vmem %s68_s18, 8192  ;;  %p1181_p12 = scmp.lt.s32.totalorder %s68_s18, %s68_s18 }
  0x1f   :  { %p1177_p11 = scmp.ne.s32.totalorder %s68_s18, %s1176_s1  ;;  %p1182_p13 = scmp.lt.s32.totalorder %s1176_s1, %s1176_s1 }
  0x21   :  { %p1183_p0 = por %p1182_p13, %p1181_p12 }
  0x23   :  { %p1184_p1 = pnand %p1183_p0, %p1177_p11 }
  0x25   :  { %1187 = shalt.err (!%p1184_p1)
}
  0x26   :  { %73 = dma.hbm_to_vmem [thread:$0]  %s1553_s5, 8192, %s68_s18, [#allocation9], %s1333_s13, %s1333_s13, %s1334_s14  }
  0x27   :  { %s1188_s16 = scalar_lea.hbm %s1548_s0, 128 }
  0x28   :  { %p1189_p2 = scmp.ne.s32.totalorder %s1548_s0, %s1188_s16  ;;  %p1192_p3 = scmp.lt.u32.totalorder %s1188_s16, %s1548_s0 }
  0x2a   :  { %p1194_p4 = pnand %p1192_p3, %p1189_p2 }
  0x2c   :  { %1197 = shalt.err (!%p1194_p4)
}
  0x2d   :  { %s1198_s24 = scalar_lea.vmem %s31_s20, 128  ;;  %p1203_p6 = scmp.lt.s32.totalorder %s31_s20, %s31_s20 }
  0x2e   :  { %p1199_p5 = scmp.ne.s32.totalorder %s31_s20, %s1198_s24  ;;  %p1204_p7 = scmp.lt.s32.totalorder %s1198_s24, %s1198_s24 }
  0x30   :  { %p1205_p8 = por %p1204_p7, %p1203_p6 }
  0x32   :  { %p1206_p9 = pnand %p1205_p8, %p1199_p5 }
  0x34   :  { %1209 = shalt.err (!%p1206_p9)
}
  0x35   :  { %33 = dma.hbm_to_vmem [thread:$0]  %s1548_s0, 128, %s31_s20, [#allocation3]  }
  0x36   :  { %s1337_s25 = smov [#allocation7]   ;;  %s1338_s27 = smov [#allocation10]  }
  0x37   :  { %s53_s26 = sshll.u32 %s1337_s25, 4  ;;  %s81_s28 = sshll.u32 %s1338_s27, 4  ;;  %s54_s26 = int_to_ptr.vmem [resolvable:$true] %s53_s26  ;;  %s82_s28 = int_to_ptr.vmem [resolvable:$true] %s81_s28 }
  0x38   :  { %s1210_s29 = scalar_lea.hbm %s1551_s3, 8192 }
  0x39   :  { %p1211_p10 = scmp.ne.s32.totalorder %s1551_s3, %s1210_s29  ;;  %p1214_p11 = scmp.lt.u32.totalorder %s1210_s29, %s1551_s3 }
  0x3b   :  { %p1216_p12 = pnand %p1214_p11, %p1211_p10 }
  0x3d   :  { %1219 = shalt.err (!%p1216_p12)
}
  0x3e   :  { %s1220_s0 = scalar_lea.vmem %s54_s26, 8192  ;;  %p1225_p0 = scmp.lt.s32.totalorder %s54_s26, %s54_s26 }
  0x3f   :  { %p1221_p13 = scmp.ne.s32.totalorder %s54_s26, %s1220_s0  ;;  %p1226_p1 = scmp.lt.s32.totalorder %s1220_s0, %s1220_s0 }
  0x41   :  { %p1227_p2 = por %p1226_p1, %p1225_p0 }
  0x43   :  { %p1228_p3 = pnand %p1227_p2, %p1221_p13 }
  0x45   :  { %1231 = shalt.err (!%p1228_p3)
}
  0x46   :  { %59 = dma.hbm_to_vmem [thread:$0]  %s1551_s3, 8192, %s54_s26, [#allocation6], %s1333_s13, %s1333_s13, %s1334_s14  }
  0x47   :  { %s1232_s24 = scalar_lea.hbm %s1555_s7, 8192 }
  0x48   :  { %p1233_p4 = scmp.ne.s32.totalorder %s1555_s7, %s1232_s24  ;;  %p1236_p5 = scmp.lt.u32.totalorder %s1232_s24, %s1555_s7 }
  0x4a   :  { %p1238_p6 = pnand %p1236_p5, %p1233_p4 }
  0x4c   :  { %1241 = shalt.err (!%p1238_p6)
}
  0x4d   :  { %s1242_s1 = scalar_lea.vmem %s82_s28, 8192  ;;  %p1247_p8 = scmp.lt.s32.totalorder %s82_s28, %s82_s28 }
  0x4e   :  { %p1243_p7 = scmp.ne.s32.totalorder %s82_s28, %s1242_s1  ;;  %p1248_p9 = scmp.lt.s32.totalorder %s1242_s1, %s1242_s1 }
  0x50   :  { %p1249_p10 = por %p1248_p9, %p1247_p8 }
  0x52   :  { %p1250_p11 = pnand %p1249_p10, %p1243_p7 }
  0x54   :  { %1253 = shalt.err (!%p1250_p11)
}
  0x55   :  { %87 = dma.hbm_to_vmem [thread:$0]  %s1555_s7, 8192, %s82_s28, [#allocation9], %s1333_s13, %s1333_s13, %s1334_s14  }
  0x56   :  { %s1339_s22 = smov [#allocation11]   ;;  %s1254_s16 = scalar_lea.hbm %s1557_s9, 8192 }
  0x57   :  { %s95_s29 = sshll.u32 %s1339_s22, 4  ;;  %p1255_p12 = scmp.ne.s32.totalorder %s1557_s9, %s1254_s16  ;;  %s96_s29 = int_to_ptr.vmem [resolvable:$true] %s95_s29 }
  0x58   :  { %p1258_p13 = scmp.lt.u32.totalorder %s1254_s16, %s1557_s9 }
  0x5a   :  { %p1260_p0 = pnand %p1258_p13, %p1255_p12 }
  0x5c   :  { %1263 = shalt.err (!%p1260_p0)
}
  0x5d   :  { %s1264_s21 = scalar_lea.vmem %s96_s29, 8192  ;;  %p1269_p2 = scmp.lt.s32.totalorder %s96_s29, %s96_s29 }
  0x5e   :  { %p1265_p1 = scmp.ne.s32.totalorder %s96_s29, %s1264_s21  ;;  %p1270_p3 = scmp.lt.s32.totalorder %s1264_s21, %s1264_s21 }
  0x60   :  { %p1271_p4 = por %p1270_p3, %p1269_p2 }
  0x62   :  { %p1272_p5 = pnand %p1271_p4, %p1265_p1 }
  0x64   :  { %1275 = shalt.err (!%p1272_p5)
}
  0x65   :  { %101 = dma.hbm_to_vmem [thread:$0]  %s1557_s9, 8192, %s96_s29, [#allocation12], %s1333_s13, %s1333_s13, %s1334_s14  }
  0x66   :  { %1320 = dma.done.wait [#allocation3], 128  }
  0x67   :  { %1321 = vsyncadd [#allocation3], 4294967168 }
  0x68   :  { %1322 = dma.done.wait [#allocation6], 9216  }
  0x69   :  { %1323 = vsyncadd [#allocation6], 4294958080 }
  0x6a   :  { %1324 = dma.done.wait [#allocation9], 16384  }
  0x6b   :  { %1325 = vsyncadd [#allocation9], 4294950912 }
  0x6c   :  { %1326 = dma.done.wait [#allocation12], 8192  }
  0x6d   :  { %1327 = vsyncadd [#allocation12], 4294959104  ;;  %v1340_v0 = vmov 0.0   ;;  %v124_v1 = vld [vmem:[#allocation5 + $0x8] sm:$0xff]  ;;  %v126_v2 = vld [vmem:[#allocation5 + $0x18] sm:$0xff]  ;;  %vm143_vm0 = vcmask 261120  }
  0x6e   :  { %211 = vmatprep.mubr.f32.mxu0 %v1340_v0  ;;  %v123_v3 = vld [vmem:[#allocation5] sm:$0xff]  ;;  %v865_v4 = vpack.c.bf16 %v126_v2, %v124_v1  ;;  %v125_v5 = vld [vmem:[#allocation5 + $0x10] sm:$0xff]  ;;  %v128_v6 = vld [vmem:[#allocation5 + $0x28] sm:$0xff] }
  0x6f   :  { %v130_v7 = vld [vmem:[#allocation5 + $0x38] sm:$0xff]  ;;  %v867_v8 = vpack.c.bf16 %v125_v5, %v123_v3  ;;  %v127_v10 = vld [vmem:[#allocation5 + $0x20] sm:$0xff]  ;;  %v129_v11 = vld [vmem:[#allocation5 + $0x30] sm:$0xff] }
  0x70   :  { %v869_v9 = vpack.c.bf16 %v130_v7, %v128_v6  ;;  %866 = vmatprep.subr.bf16.mxu0 %v865_v4  ;;  %v221_v12 = vld [vmem:[#allocation7 + $0x8] sm:$0xff]  ;;  %v223_v13 = vld [vmem:[#allocation7 + $0x18] sm:$0xff]  ;;  %v220_v14 = vld [vmem:[#allocation7] sm:$0xff]  ;;  %v871_v15 = vpack.c.bf16 %v129_v11, %v127_v10 }
  0x71   :  { %868 = vmatpush1.bf16.msra.mxu0 %v867_v8  ;;  %v873_v16 = vpack.c.bf16 %v223_v13, %v221_v12  ;;  %v222_v17 = vld [vmem:[#allocation7 + $0x10] sm:$0xff]  ;;  %v225_v18 = vld [vmem:[#allocation7 + $0x28] sm:$0xff]  ;;  %v227_v19 = vld [vmem:[#allocation7 + $0x38] sm:$0xff] }
  0x72   :  { %870 = vmatprep.subr.bf16.mxu0 %v869_v9  ;;  %v875_v20 = vpack.c.bf16 %v222_v17, %v220_v14  ;;  %v877_v21 = vpack.c.bf16 %v227_v19, %v225_v18  ;;  %v224_v22 = vld [vmem:[#allocation7 + $0x20] sm:$0xff]  ;;  %v226_v23 = vld [vmem:[#allocation7 + $0x30] sm:$0xff]  ;;  %v229_v24 = vld [vmem:[#allocation7 + $0x48] sm:$0xff] }
  0x73   :  { %874 = vmatprep.subr.bf16.mxu1 %v873_v16  ;;  %v231_v25 = vld [vmem:[#allocation7 + $0x58] sm:$0xff]  ;;  %v879_v26 = vpack.c.bf16 %v226_v23, %v224_v22  ;;  %v228_v29 = vld [vmem:[#allocation7 + $0x40] sm:$0xff]  ;;  %v230_v30 = vld [vmem:[#allocation7 + $0x50] sm:$0xff] }
  0x74   :  { %876 = vmatpush1.bf16.msra.mxu1 %v875_v20  ;;  %v122_v27 = vld [vmem:[#allocation2] sm:$0xff]  ;;  %v881_v28 = vpack.c.bf16 %v231_v25, %v229_v24  ;;  %v233_v31 = vld [vmem:[#allocation7 + $0x68] sm:$0xff]  ;;  %v883_v33 = vpack.c.bf16 %v230_v30, %v228_v29  ;;  %v232_v35 = vld [vmem:[#allocation7 + $0x60] sm:$0xff] }
  0x75   :  { %872 = vmatpush1.bf16.msra.mxu0 %v871_v15  ;;  %878 = vmatprep.subr.bf16.mxu1 %v877_v21  ;;  %v235_v32 = vld [vmem:[#allocation7 + $0x78] sm:$0xff]  ;;  %v234_v36 = vld [vmem:[#allocation7 + $0x70] sm:$0xff]  ;;  %v237_v37 = vld [vmem:[#allocation7 + $0x88] sm:$0xff] }
  0x76   :  { %v885_v34 = vpack.c.bf16 %v235_v32, %v233_v31  ;;  %v239_v38 = vld [vmem:[#allocation7 + $0x98] sm:$0xff]  ;;  %v887_v39 = vpack.c.bf16 %v234_v36, %v232_v35  ;;  %v236_v41 = vld [vmem:[#allocation7 + $0x80] sm:$0xff]  ;;  %v238_v42 = vld [vmem:[#allocation7 + $0x90] sm:$0xff] }
  0x77   :  { %v889_v40 = vpack.c.bf16 %v239_v38, %v237_v37  ;;  %v241_v43 = vld [vmem:[#allocation7 + $0xa8] sm:$0xff]  ;;  %v243_v44 = vld [vmem:[#allocation7 + $0xb8] sm:$0xff]  ;;  %v891_v45 = vpack.c.bf16 %v238_v42, %v236_v41  ;;  %v240_v47 = vld [vmem:[#allocation7 + $0xa0] sm:$0xff] }
  0x78   :  { %864 = vmatmul.mubr.msk.f32.vlgmr.msra.gmra.mrb[0].mxu0 %vm143_vm0, %v122_v27  ;;  %880 = vmatpush1.bf16.msra.mxu1 %v879_v26  ;;  %v893_v46 = vpack.c.bf16 %v243_v44, %v241_v43  ;;  %v242_v48 = vld [vmem:[#allocation7 + $0xb0] sm:$0xff]  ;;  %v245_v49 = vld [vmem:[#allocation7 + $0xc8] sm:$0xff]  ;;  %v247_v50 = vld [vmem:[#allocation7 + $0xd8] sm:$0xff] }
  0x79   :  { %882 = vmatprep.subr.bf16.mxu1 %v881_v28  ;;  %v895_v51 = vpack.c.bf16 %v242_v48, %v240_v47  ;;  %v897_v52 = vpack.c.bf16 %v247_v50, %v245_v49  ;;  %v244_v53 = vld [vmem:[#allocation7 + $0xc0] sm:$0xff]  ;;  %v246_v54 = vld [vmem:[#allocation7 + $0xd0] sm:$0xff]  ;;  %v249_v55 = vld [vmem:[#allocation7 + $0xe8] sm:$0xff] }
  0x7a   :  { %v251_v56 = vld [vmem:[#allocation7 + $0xf8] sm:$0xff]  ;;  %v899_v57 = vpack.c.bf16 %v246_v54, %v244_v53  ;;  %v248_v59 = vld [vmem:[#allocation7 + $0xe0] sm:$0xff]  ;;  %v250_v60 = vld [vmem:[#allocation7 + $0xf0] sm:$0xff] }
  0x7b   :  { %v901_v58 = vpack.c.bf16 %v251_v56, %v249_v55  ;;  %v253_v61 = vld [vmem:[#allocation7 + $0x108] sm:$0xff]  ;;  %v255_v62 = vld [vmem:[#allocation7 + $0x118] sm:$0xff]  ;;  %v903_v63 = vpack.c.bf16 %v250_v60, %v248_v59  ;;  %v252_v1 = vld [vmem:[#allocation7 + $0x100] sm:$0xff] }
  0x7c   :  { %884 = vmatpush1.bf16.msra.mxu1 %v883_v33  ;;  %v905_v0 = vpack.c.bf16 %v255_v62, %v253_v61  ;;  %v254_v2 = vld [vmem:[#allocation7 + $0x110] sm:$0xff]  ;;  %v257_v3 = vld [vmem:[#allocation7 + $0x128] sm:$0xff]  ;;  %v259_v4 = vld [vmem:[#allocation7 + $0x138] sm:$0xff] }
  0x7d   :  { %886 = vmatprep.subr.bf16.mxu1 %v885_v34  ;;  %v907_v5 = vpack.c.bf16 %v254_v2, %v252_v1  ;;  %v909_v6 = vpack.c.bf16 %v259_v4, %v257_v3  ;;  %v256_v7 = vld [vmem:[#allocation7 + $0x120] sm:$0xff]  ;;  %v258_v8 = vld [vmem:[#allocation7 + $0x130] sm:$0xff]  ;;  %v261_v9 = vld [vmem:[#allocation7 + $0x148] sm:$0xff] }
  0x7e   :  { %v263_v10 = vld [vmem:[#allocation7 + $0x158] sm:$0xff]  ;;  %v911_v11 = vpack.c.bf16 %v258_v8, %v256_v7  ;;  %v260_v13 = vld [vmem:[#allocation7 + $0x140] sm:$0xff]  ;;  %v262_v14 = vld [vmem:[#allocation7 + $0x150] sm:$0xff] }
  0x7f   :  { %v913_v12 = vpack.c.bf16 %v263_v10, %v261_v9  ;;  %v265_v15 = vld [vmem:[#allocation7 + $0x168] sm:$0xff]  ;;  %v267_v16 = vld [vmem:[#allocation7 + $0x178] sm:$0xff]  ;;  %v915_v17 = vpack.c.bf16 %v262_v14, %v260_v13  ;;  %v264_v19 = vld [vmem:[#allocation7 + $0x160] sm:$0xff] }
  0x80   :  { %888 = vmatpush1.bf16.msra.mxu1 %v887_v39  ;;  %v917_v18 = vpack.c.bf16 %v267_v16, %v265_v15  ;;  %v266_v20 = vld [vmem:[#allocation7 + $0x170] sm:$0xff]  ;;  %v269_v21 = vld [vmem:[#allocation7 + $0x188] sm:$0xff]  ;;  %v271_v22 = vld [vmem:[#allocation7 + $0x198] sm:$0xff] }
  0x81   :  { %890 = vmatprep.subr.bf16.mxu1 %v889_v40  ;;  %v919_v23 = vpack.c.bf16 %v266_v20, %v264_v19  ;;  %v921_v24 = vpack.c.bf16 %v271_v22, %v269_v21  ;;  %v268_v25 = vld [vmem:[#allocation7 + $0x180] sm:$0xff]  ;;  %v270_v26 = vld [vmem:[#allocation7 + $0x190] sm:$0xff]  ;;  %v273_v27 = vld [vmem:[#allocation7 + $0x1a8] sm:$0xff] }
  0x82   :  { %v275_v28 = vld [vmem:[#allocation7 + $0x1b8] sm:$0xff]  ;;  %v923_v29 = vpack.c.bf16 %v270_v26, %v268_v25  ;;  %v272_v31 = vld [vmem:[#allocation7 + $0x1a0] sm:$0xff]  ;;  %v274_v32 = vld [vmem:[#allocation7 + $0x1b0] sm:$0xff] }
  0x83   :  { %v925_v30 = vpack.c.bf16 %v275_v28, %v273_v27  ;;  %v277_v33 = vld [vmem:[#allocation7 + $0x1c8] sm:$0xff]  ;;  %v279_v34 = vld [vmem:[#allocation7 + $0x1d8] sm:$0xff]  ;;  %v927_v35 = vpack.c.bf16 %v274_v32, %v272_v31  ;;  %v276_v37 = vld [vmem:[#allocation7 + $0x1c0] sm:$0xff] }
  0x84   :  { %892 = vmatpush1.bf16.msra.mxu1 %v891_v45  ;;  %v929_v36 = vpack.c.bf16 %v279_v34, %v277_v33  ;;  %v278_v38 = vld [vmem:[#allocation7 + $0x1d0] sm:$0xff]  ;;  %v281_v40 = vld [vmem:[#allocation7 + $0x1e8] sm:$0xff]  ;;  %v283_v41 = vld [vmem:[#allocation7 + $0x1f8] sm:$0xff] }
  0x85   :  { %894 = vmatprep.subr.bf16.mxu1 %v893_v46  ;;  %v931_v39 = vpack.c.bf16 %v278_v38, %v276_v37  ;;  %v933_v42 = vpack.c.bf16 %v283_v41, %v281_v40  ;;  %v280_v43 = vld [vmem:[#allocation7 + $0x1e0] sm:$0xff]  ;;  %v282_v44 = vld [vmem:[#allocation7 + $0x1f0] sm:$0xff]  ;;  %v370_v46 = vld [vmem:[#allocation8 + $0x8] sm:$0xff] }
  0x86   :  { %v935_v45 = vpack.c.bf16 %v282_v44, %v280_v43  ;;  %v372_v47 = vld [vmem:[#allocation8 + $0x18] sm:$0xff]  ;;  %v369_v48 = vld [vmem:[#allocation8] sm:$0xff]  ;;  %v371_v50 = vld [vmem:[#allocation8 + $0x10] sm:$0xff] }
  0x87   :  { %v937_v49 = vpack.c.bf16 %v372_v47, %v370_v46  ;;  %v939_v53 = vpack.c.bf16 %v371_v50, %v369_v48  ;;  %v373_v55 = vld [vmem:[#allocation8 + $0x20] sm:$0xff]  ;;  %v375_v56 = vld [vmem:[#allocation8 + $0x30] sm:$0xff]  ;;  %v410_v41 = vld [vmem:[#allocation8 + $0x148] sm:$0xff] }
  0x88   :  { %896 = vmatpush1.bf16.msra.mxu1 %v895_v51  ;;  %v374_v51 = vld [vmem:[#allocation8 + $0x28] sm:$0xff]  ;;  %v943_v59 = vpack.c.bf16 %v375_v56, %v373_v55  ;;  %v377_v61 = vld [vmem:[#allocation8 + $0x40] sm:$0xff]  ;;  %v379_v62 = vld [vmem:[#allocation8 + $0x50] sm:$0xff] }
  0x89   :  { %898 = vmatprep.subr.bf16.mxu1 %v897_v52  ;;  %v376_v52 = vld [vmem:[#allocation8 + $0x38] sm:$0xff]  ;;  %938 = vmatprep.subr.bf16.mxu0 %v937_v49  ;;  %v947_v1 = vpack.c.bf16 %v379_v62, %v377_v61  ;;  %v381_v3 = vld [vmem:[#allocation8 + $0x60] sm:$0xff]  ;;  %v383_v4 = vld [vmem:[#allocation8 + $0x70] sm:$0xff] }
  0x8a   :  { %v941_v54 = vpack.c.bf16 %v376_v52, %v374_v51  ;;  %940 = vmatpush1.bf16.msra.mxu0 %v939_v53  ;;  %v951_v7 = vpack.c.bf16 %v383_v4, %v381_v3  ;;  %v385_v9 = vld [vmem:[#allocation8 + $0x80] sm:$0xff]  ;;  %v387_v10 = vld [vmem:[#allocation8 + $0x90] sm:$0xff]  ;;  %v414_v47 = vld [vmem:[#allocation8 + $0x168] sm:$0xff] }
  0x8b   :  { %v955_v13 = vpack.c.bf16 %v387_v10, %v385_v9  ;;  %v389_v15 = vld [vmem:[#allocation8 + $0xa0] sm:$0xff]  ;;  %v391_v16 = vld [vmem:[#allocation8 + $0xb0] sm:$0xff]  ;;  %v416_v48 = vld [vmem:[#allocation8 + $0x178] sm:$0xff] }
  0x8c   :  { %900 = vmatpush1.bf16.msra.mxu1 %v899_v57  ;;  %v378_v57 = vld [vmem:[#allocation8 + $0x48] sm:$0xff]  ;;  %942 = vmatprep.subr.bf16.mxu0 %v941_v54  ;;  %v959_v19 = vpack.c.bf16 %v391_v16, %v389_v15  ;;  %v393_v21 = vld [vmem:[#allocation8 + $0xc0] sm:$0xff]  ;;  %v395_v22 = vld [vmem:[#allocation8 + $0xd0] sm:$0xff]  ;;  %v981_v50 = vpack.c.bf16 %v416_v48, %v414_v47 }
  0x8d   :  { %902 = vmatprep.subr.bf16.mxu1 %v901_v58  ;;  %v380_v58 = vld [vmem:[#allocation8 + $0x58] sm:$0xff]  ;;  %v963_v25 = vpack.c.bf16 %v395_v22, %v393_v21  ;;  %v397_v27 = vld [vmem:[#allocation8 + $0xe0] sm:$0xff]  ;;  %v399_v28 = vld [vmem:[#allocation8 + $0xf0] sm:$0xff] }
  0x8e   :  { %v945_v60 = vpack.c.bf16 %v380_v58, %v378_v57  ;;  %944 = vmatpush1.bf16.msra.mxu0 %v943_v59  ;;  %v967_v31 = vpack.c.bf16 %v399_v28, %v397_v27  ;;  %v401_v33 = vld [vmem:[#allocation8 + $0x100] sm:$0xff]  ;;  %v403_v34 = vld [vmem:[#allocation8 + $0x110] sm:$0xff]  ;;  %v418_v53 = vld [vmem:[#allocation8 + $0x188] sm:$0xff] }
  0x8f   :  { %v971_v37 = vpack.c.bf16 %v403_v34, %v401_v33  ;;  %v407_v40 = vld [vmem:[#allocation8 + $0x130] sm:$0xff]  ;;  %v413_v51 = vld [vmem:[#allocation8 + $0x160] sm:$0xff]  ;;  %v420_v54 = vld [vmem:[#allocation8 + $0x198] sm:$0xff] }
  0x90   :  { %904 = vmatpush1.bf16.msra.mxu1 %v903_v63  ;;  %v382_v63 = vld [vmem:[#allocation8 + $0x68] sm:$0xff]  ;;  %946 = vmatprep.subr.bf16.mxu0 %v945_v60  ;;  %v411_v46 = vld [vmem:[#allocation8 + $0x150] sm:$0xff]  ;;  %v985_v56 = vpack.c.bf16 %v420_v54, %v418_v53  ;;  %v417_v57 = vld [vmem:[#allocation8 + $0x180] sm:$0xff] }
  0x91   :  { %906 = vmatprep.subr.bf16.mxu1 %v905_v0  ;;  %v384_v0 = vld [vmem:[#allocation8 + $0x78] sm:$0xff]  ;;  %v415_v52 = vld [vmem:[#allocation8 + $0x170] sm:$0xff]  ;;  %v422_v59 = vld [vmem:[#allocation8 + $0x1a8] sm:$0xff] }
  0x92   :  { %v949_v2 = vpack.c.bf16 %v384_v0, %v382_v63  ;;  %948 = vmatpush1.bf16.msra.mxu0 %v947_v1  ;;  %v983_v55 = vpack.c.bf16 %v415_v52, %v413_v51  ;;  %v419_v58 = vld [vmem:[#allocation8 + $0x190] sm:$0xff]  ;;  %v424_v60 = vld [vmem:[#allocation8 + $0x1b8] sm:$0xff]  ;;  %v421_v63 = vld [vmem:[#allocation8 + $0x1a0] sm:$0xff] }
  0x93   :  { %v987_v61 = vpack.c.bf16 %v419_v58, %v417_v57  ;;  %v989_v62 = vpack.c.bf16 %v424_v60, %v422_v59  ;;  %v423_v0 = vld [vmem:[#allocation8 + $0x1b0] sm:$0xff]  ;;  %v426_v1 = vld [vmem:[#allocation8 + $0x1c8] sm:$0xff]  ;;  %v432_v22 = vld [vmem:[#allocation8 + $0x1f8] sm:$0xff] }
  0x94   :  { %908 = vmatpush1.bf16.msra.mxu1 %v907_v5  ;;  %v386_v5 = vld [vmem:[#allocation8 + $0x88] sm:$0xff]  ;;  %950 = vmatprep.subr.bf16.mxu0 %v949_v2  ;;  %v428_v2 = vld [vmem:[#allocation8 + $0x1d8] sm:$0xff]  ;;  %v991_v3 = vpack.c.bf16 %v423_v0, %v421_v63  ;;  %v530_v48 = vld [vmem:[#allocation10 + $0x60] sm:$0xff] }
  0x95   :  { %910 = vmatprep.subr.bf16.mxu1 %v909_v6  ;;  %v388_v6 = vld [vmem:[#allocation8 + $0x98] sm:$0xff]  ;;  %v993_v4 = vpack.c.bf16 %v428_v2, %v426_v1  ;;  %v430_v21 = vld [vmem:[#allocation8 + $0x1e8] sm:$0xff]  ;;  %v534_v54 = vld [vmem:[#allocation10 + $0x80] sm:$0xff] }
  0x96   :  { %v953_v8 = vpack.c.bf16 %v388_v6, %v386_v5  ;;  %952 = vmatpush1.bf16.msra.mxu0 %v951_v7  ;;  %v133_v5 = vlaneseq  ;;  %v519_v27 = vld [vmem:[#allocation10 + $0x8] sm:$0xff]  ;;  %v521_v28 = vld [vmem:[#allocation10 + $0x18] sm:$0xff]  ;;  %v538_v60 = vld [vmem:[#allocation10 + $0xa0] sm:$0xff] }
  0x97   :  { %v525_v33 = vld [vmem:[#allocation10 + $0x38] sm:$0xff]  ;;  %v542_v2 = vld [vmem:[#allocation10 + $0xc0] sm:$0xff] }
  0x98   :  { %912 = vmatpush1.bf16.msra.mxu1 %v911_v11  ;;  %v390_v11 = vld [vmem:[#allocation8 + $0xa8] sm:$0xff]  ;;  %954 = vmatprep.subr.bf16.mxu0 %v953_v8  ;;  %v134_v6 = vshrl.u32 %v133_v5, 7  ;;  %v131_v8 = vld [vmem:[%s1550_s2] sm:$0x3] }
  0x99   :  { %914 = vmatprep.subr.bf16.mxu1 %v913_v12  ;;  %v392_v12 = vld [vmem:[#allocation8 + $0xb8] sm:$0xff] }
  0x9a   :  { %v957_v14 = vpack.c.bf16 %v392_v12, %v390_v11  ;;  %956 = vmatpush1.bf16.msra.mxu0 %v955_v13  ;;  %v1495_v7 = vsub.s32 0, %v134_v6  ;;  %v1500_v9 = vsub.s32 1, %v134_v6  ;;  %v537_v51 = vld [vmem:[#allocation10 + $0x98] sm:$0xff] }
  0x9b   :  { %v541_v57 = vld [vmem:[#allocation10 + $0xb8] sm:$0xff] }
  0x9c   :  { %916 = vmatpush1.bf16.msra.mxu1 %v915_v17  ;;  %v394_v17 = vld [vmem:[#allocation8 + $0xc8] sm:$0xff]  ;;  %958 = vmatprep.subr.bf16.mxu0 %v957_v14  ;;  %v136_v10 = vrot.slane %v131_v8, %v1495_v7  ;;  %v140_v11 = vrot.slane %v131_v8, %v1500_v9  ;;  %v545_v63 = vld [vmem:[#allocation10 + $0xd8] sm:$0xff] }
  0x9d   :  { %918 = vmatprep.subr.bf16.mxu1 %v917_v18  ;;  %v396_v18 = vld [vmem:[#allocation8 + $0xd8] sm:$0xff] }
  0x9e   :  { %v961_v20 = vpack.c.bf16 %v396_v18, %v394_v17  ;;  %960 = vmatpush1.bf16.msra.mxu0 %v959_v19  ;;  %v425_v18 = vld [vmem:[#allocation8 + $0x1c0] sm:$0xff]  ;;  %v427_v19 = vld [vmem:[#allocation8 + $0x1d0] sm:$0xff]  ;;  %v549_v5 = vld [vmem:[#allocation10 + $0xf8] sm:$0xff] }
  0xa0   :  { %920 = vmatpush1.bf16.msra.mxu1 %v919_v23  ;;  %v398_v23 = vld [vmem:[#allocation8 + $0xe8] sm:$0xff]  ;;  %962 = vmatprep.subr.bf16.mxu0 %v961_v20  ;;  %v995_v20 = vpack.c.bf16 %v427_v19, %v425_v18  ;;  %v557_v19 = vld [vmem:[#allocation10 + $0x138] sm:$0xff] }
  0xa1   :  { %922 = vmatprep.subr.bf16.mxu1 %v921_v24  ;;  %v400_v24 = vld [vmem:[#allocation8 + $0xf8] sm:$0xff]  ;;  %v555_v18 = vld [vmem:[#allocation10 + $0x128] sm:$0xff] }
  0xa2   :  { %v965_v26 = vpack.c.bf16 %v400_v24, %v398_v23  ;;  %964 = vmatpush1.bf16.msra.mxu0 %v963_v25  ;;  %v997_v23 = vpack.c.bf16 %v432_v22, %v430_v21  ;;  %v429_v24 = vld [vmem:[#allocation8 + $0x1e0] sm:$0xff]  ;;  %v431_v25 = vld [vmem:[#allocation8 + $0x1f0] sm:$0xff]  ;;  %v1037_v21 = vpack.c.bf16 %v557_v19, %v555_v18  ;;  %v676_v19 = vld [vmem:[#allocation11 + $0x48] sm:$0xff] }
  0xa3   :  { %v554_v22 = vld [vmem:[#allocation10 + $0x120] sm:$0xff]  ;;  %v673_v18 = vld [vmem:[#allocation11 + $0x30] sm:$0xff] }
  0xa4   :  { %924 = vmatpush1.bf16.msra.mxu1 %v923_v29  ;;  %v402_v29 = vld [vmem:[#allocation8 + $0x108] sm:$0xff]  ;;  %966 = vmatprep.subr.bf16.mxu0 %v965_v26  ;;  %v999_v26 = vpack.c.bf16 %v431_v25, %v429_v24  ;;  %v561_v25 = vld [vmem:[#allocation10 + $0x158] sm:$0xff] }
  0xa5   :  { %926 = vmatprep.subr.bf16.mxu1 %v925_v30  ;;  %v404_v30 = vld [vmem:[#allocation8 + $0x118] sm:$0xff]  ;;  %v559_v24 = vld [vmem:[#allocation10 + $0x148] sm:$0xff] }
  0xa6   :  { %v969_v32 = vpack.c.bf16 %v404_v30, %v402_v29  ;;  %968 = vmatpush1.bf16.msra.mxu0 %v967_v31  ;;  %v518_v29 = vld [vmem:[#allocation10] sm:$0xff]  ;;  %v1001_v30 = vpack.c.bf16 %v521_v28, %v519_v27  ;;  %v520_v31 = vld [vmem:[#allocation10 + $0x10] sm:$0xff]  ;;  %v1041_v27 = vpack.c.bf16 %v561_v25, %v559_v24  ;;  %v680_v25 = vld [vmem:[#allocation11 + $0x68] sm:$0xff] }
  0xa7   :  { %v1003_v34 = vpack.c.bf16 %v520_v31, %v518_v29  ;;  %v558_v28 = vld [vmem:[#allocation10 + $0x140] sm:$0xff]  ;;  %v560_v29 = vld [vmem:[#allocation10 + $0x150] sm:$0xff]  ;;  %v565_v31 = vld [vmem:[#allocation10 + $0x178] sm:$0xff] }
  0xa8   :  { %928 = vmatpush1.bf16.msra.mxu1 %v927_v35  ;;  %v406_v35 = vld [vmem:[#allocation8 + $0x128] sm:$0xff]  ;;  %970 = vmatprep.subr.bf16.mxu0 %v969_v32  ;;  %v677_v24 = vld [vmem:[#allocation11 + $0x50] sm:$0xff] }
  0xa9   :  { %930 = vmatprep.subr.bf16.mxu1 %v929_v36  ;;  %v408_v36 = vld [vmem:[#allocation8 + $0x138] sm:$0xff]  ;;  %v523_v32 = vld [vmem:[#allocation10 + $0x28] sm:$0xff] }
  0xaa   :  { %v973_v38 = vpack.c.bf16 %v408_v36, %v406_v35  ;;  %972 = vmatpush1.bf16.msra.mxu0 %v971_v37  ;;  %v1005_v35 = vpack.c.bf16 %v525_v33, %v523_v32  ;;  %v522_v36 = vld [vmem:[#allocation10 + $0x20] sm:$0xff]  ;;  %v524_v37 = vld [vmem:[#allocation10 + $0x30] sm:$0xff]  ;;  %v1043_v32 = vpack.c.bf16 %v560_v29, %v558_v28 }
  0xab   :  { %v679_v29 = vld [vmem:[#allocation11 + $0x60] sm:$0xff] }
  0xac   :  { %932 = vmatpush1.bf16.msra.mxu1 %v931_v39  ;;  %v405_v39 = vld [vmem:[#allocation8 + $0x120] sm:$0xff]  ;;  %974 = vmatprep.subr.bf16.mxu0 %v973_v38  ;;  %v527_v38 = vld [vmem:[#allocation10 + $0x48] sm:$0xff] }
  0xad   :  { %934 = vmatprep.subr.bf16.mxu1 %v933_v42  ;;  %v412_v42 = vld [vmem:[#allocation8 + $0x158] sm:$0xff]  ;;  %v975_v43 = vpack.c.bf16 %v407_v40, %v405_v39  ;;  %v1007_v40 = vpack.c.bf16 %v524_v37, %v522_v36  ;;  %v567_v36 = vld [vmem:[#allocation10 + $0x188] sm:$0xff] }
  0xae   :  { %v977_v44 = vpack.c.bf16 %v412_v42, %v410_v41  ;;  %v529_v39 = vld [vmem:[#allocation10 + $0x58] sm:$0xff]  ;;  %v526_v42 = vld [vmem:[#allocation10 + $0x40] sm:$0xff] }
  0xaf   :  { %976 = vmatpush1.bf16.msra.mxu0 %v975_v43  ;;  %v1009_v41 = vpack.c.bf16 %v529_v39, %v527_v38  ;;  %v528_v43 = vld [vmem:[#allocation10 + $0x50] sm:$0xff]  ;;  %v569_v37 = vld [vmem:[#allocation10 + $0x198] sm:$0xff] }
  0xb0   :  { %936 = vmatpush1.bf16.msra.mxu1 %v935_v45  ;;  %v409_v45 = vld [vmem:[#allocation8 + $0x140] sm:$0xff]  ;;  %978 = vmatprep.subr.bf16.mxu0 %v977_v44  ;;  %v531_v44 = vld [vmem:[#allocation10 + $0x68] sm:$0xff]  ;;  %v1049_v39 = vpack.c.bf16 %v569_v37, %v567_v36  ;;  %v685_v36 = vld [vmem:[#allocation11 + $0x90] sm:$0xff] }
  0xb1   :  { %v979_v49 = vpack.c.bf16 %v411_v46, %v409_v45  ;;  %1002 = vmatprep.subr.bf16.mxu1 %v1001_v30  ;;  %v533_v45 = vld [vmem:[#allocation10 + $0x78] sm:$0xff]  ;;  %v1011_v46 = vpack.c.bf16 %v528_v43, %v526_v42  ;;  %v563_v30 = vld [vmem:[#allocation10 + $0x168] sm:$0xff] }
  0xb2   :  { %v1013_v47 = vpack.c.bf16 %v533_v45, %v531_v44  ;;  %v1045_v33 = vpack.c.bf16 %v565_v31, %v563_v30  ;;  %v571_v42 = vld [vmem:[#allocation10 + $0x1a8] sm:$0xff]  ;;  %v573_v43 = vld [vmem:[#allocation10 + $0x1b8] sm:$0xff]  ;;  %v681_v30 = vld [vmem:[#allocation11 + $0x70] sm:$0xff] }
  0xb3   :  { %980 = vmatpush1.bf16.msra.mxu0 %v979_v49  ;;  %v532_v49 = vld [vmem:[#allocation10 + $0x70] sm:$0xff]  ;;  %v1053_v45 = vpack.c.bf16 %v573_v43, %v571_v42  ;;  %v684_v31 = vld [vmem:[#allocation11 + $0x88] sm:$0xff] }
  0xb4   :  { %982 = vmatprep.subr.bf16.mxu0 %v981_v50  ;;  %v535_v50 = vld [vmem:[#allocation10 + $0x88] sm:$0xff]  ;;  %v1015_v52 = vpack.c.bf16 %v532_v49, %v530_v48  ;;  %v577_v49 = vld [vmem:[#allocation10 + $0x1d8] sm:$0xff]  ;;  %v689_v42 = vld [vmem:[#allocation11 + $0xb0] sm:$0xff] }
  0xb5   :  { %v1017_v53 = vpack.c.bf16 %v537_v51, %v535_v50  ;;  %v575_v48 = vld [vmem:[#allocation10 + $0x1c8] sm:$0xff] }
  0xb6   :  { %v1057_v51 = vpack.c.bf16 %v577_v49, %v575_v48  ;;  %v688_v37 = vld [vmem:[#allocation11 + $0xa8] sm:$0xff]  ;;  %v693_v48 = vld [vmem:[#allocation11 + $0xd0] sm:$0xff] }
  0xb7   :  { %984 = vmatpush1.bf16.msra.mxu0 %v983_v55  ;;  %v536_v55 = vld [vmem:[#allocation10 + $0x90] sm:$0xff]  ;;  %v692_v43 = vld [vmem:[#allocation11 + $0xc8] sm:$0xff] }
  0xb8   :  { %986 = vmatprep.subr.bf16.mxu0 %v985_v56  ;;  %v539_v56 = vld [vmem:[#allocation10 + $0xa8] sm:$0xff]  ;;  %v1019_v58 = vpack.c.bf16 %v536_v55, %v534_v54 }
  0xb9   :  { %v1021_v59 = vpack.c.bf16 %v541_v57, %v539_v56  ;;  %v696_v49 = vld [vmem:[#allocation11 + $0xe8] sm:$0xff] }
  0xbb   :  { %988 = vmatpush1.bf16.msra.mxu0 %v987_v61  ;;  %v540_v61 = vld [vmem:[#allocation10 + $0xb0] sm:$0xff] }
  0xbc   :  { %990 = vmatprep.subr.bf16.mxu0 %v989_v62  ;;  %v543_v62 = vld [vmem:[#allocation10 + $0xc8] sm:$0xff]  ;;  %v1023_v0 = vpack.c.bf16 %v540_v61, %v538_v60  ;;  %v574_v61 = vld [vmem:[#allocation10 + $0x1c0] sm:$0xff] }
  0xbd   :  { %v1025_v1 = vpack.c.bf16 %v545_v63, %v543_v62  ;;  %v576_v62 = vld [vmem:[#allocation10 + $0x1d0] sm:$0xff] }
  0xbe   :  { %v1059_v63 = vpack.c.bf16 %v576_v62, %v574_v61  ;;  %v704_v61 = vld [vmem:[#allocation11 + $0x128] sm:$0xff]  ;;  %v706_v62 = vld [vmem:[#allocation11 + $0x138] sm:$0xff] }
  0xbf   :  { %992 = vmatpush1.bf16.msra.mxu0 %v991_v3  ;;  %v544_v3 = vld [vmem:[#allocation10 + $0xd0] sm:$0xff] }
  0xc0   :  { %994 = vmatprep.subr.bf16.mxu0 %v993_v4  ;;  %v547_v4 = vld [vmem:[#allocation10 + $0xe8] sm:$0xff]  ;;  %v1027_v6 = vpack.c.bf16 %v544_v3, %v542_v2  ;;  %v578_v3 = vld [vmem:[#allocation10 + $0x1e0] sm:$0xff] }
  0xc1   :  { %v1029_v8 = vpack.c.bf16 %v549_v5, %v547_v4  ;;  %v580_v4 = vld [vmem:[#allocation10 + $0x1f0] sm:$0xff] }
  0xc2   :  { %v1063_v5 = vpack.c.bf16 %v580_v4, %v578_v3  ;;  %v708_v3 = vld [vmem:[#allocation11 + $0x148] sm:$0xff]  ;;  %v710_v4 = vld [vmem:[#allocation11 + $0x158] sm:$0xff] }
  0xc3   :  { %996 = vmatpush1.bf16.msra.mxu0 %v995_v20 }
  0xc4   :  { %998 = vmatprep.subr.bf16.mxu0 %v997_v23  ;;  %v556_v23 = vld [vmem:[#allocation10 + $0x130] sm:$0xff] }
  0xc7   :  { %1000 = vmatpush1.bf16.msra.mxu0 %v999_v26  ;;  %v1039_v26 = vpack.c.bf16 %v556_v23, %v554_v22  ;;  %v675_v23 = vld [vmem:[#allocation11 + $0x40] sm:$0xff] }
 0x14b   :  { %v213_v12 = vpop.f32.mrb[0].mxu0 }
 0x14c   :  { %v214_v13 = vadd.f32 %v213_v12, %v136_v10  ;;  %v215_v14 = vpop.f32.mrb[1].mxu0  ;;  %v546_v10 = vld [vmem:[#allocation10 + $0xe0] sm:$0xff]  ;;  %v551_v12 = vld [vmem:[#allocation10 + $0x108] sm:$0xff] }
 0x14d   :  { %v216_v15 = vadd.f32 %v215_v14, %v140_v11  ;;  %v548_v11 = vld [vmem:[#allocation10 + $0xf0] sm:$0xff] }
 0x14e   :  { %v218_v17 = vmax.f32 %v214_v13, 0.0  ;;  %v553_v13 = vld [vmem:[#allocation10 + $0x118] sm:$0xff]  ;;  %v1031_v14 = vpack.c.bf16 %v548_v11, %v546_v10  ;;  %v667_v10 = vld [vmem:[#allocation11] sm:$0xff] }
 0x14f   :  { %v219_v16 = vmax.f32 %v216_v15, 0.0  ;;  %v1033_v15 = vpack.c.bf16 %v553_v13, %v551_v12  ;;  %v669_v12 = vld [vmem:[#allocation11 + $0x10] sm:$0xff]  ;;  %v672_v13 = vld [vmem:[#allocation11 + $0x28] sm:$0xff] }
 0x151   :  { %360 = vmatprep.mubr.f32.mxu1 %v219_v16  ;;  %v550_v16 = vld [vmem:[#allocation10 + $0x100] sm:$0xff] }
 0x152   :  { %361 = vmatmul.mubr.f32.vlgmr.msra.gmra.mrb[0].mxu1 %v218_v17  ;;  %v552_v17 = vld [vmem:[#allocation10 + $0x110] sm:$0xff] }
 0x153   :  { %1004 = vmatpush1.bf16.msra.mxu1 %v1003_v34  ;;  %v1035_v20 = vpack.c.bf16 %v552_v17, %v550_v16  ;;  %v562_v34 = vld [vmem:[#allocation10 + $0x160] sm:$0xff] }
 0x154   :  { %1006 = vmatprep.subr.bf16.mxu1 %v1005_v35  ;;  %v564_v35 = vld [vmem:[#allocation10 + $0x170] sm:$0xff]  ;;  %v671_v17 = vld [vmem:[#allocation11 + $0x20] sm:$0xff] }
 0x155   :  { %v1047_v38 = vpack.c.bf16 %v564_v35, %v562_v34  ;;  %v683_v35 = vld [vmem:[#allocation11 + $0x80] sm:$0xff] }
 0x157   :  { %1008 = vmatpush1.bf16.msra.mxu1 %v1007_v40  ;;  %v566_v40 = vld [vmem:[#allocation10 + $0x180] sm:$0xff] }
 0x158   :  { %1010 = vmatprep.subr.bf16.mxu1 %v1009_v41  ;;  %v568_v41 = vld [vmem:[#allocation10 + $0x190] sm:$0xff] }
 0x159   :  { %v1051_v44 = vpack.c.bf16 %v568_v41, %v566_v40  ;;  %v687_v41 = vld [vmem:[#allocation11 + $0xa0] sm:$0xff] }
 0x15b   :  { %1012 = vmatpush1.bf16.msra.mxu1 %v1011_v46  ;;  %v570_v46 = vld [vmem:[#allocation10 + $0x1a0] sm:$0xff] }
 0x15c   :  { %1014 = vmatprep.subr.bf16.mxu1 %v1013_v47  ;;  %v572_v47 = vld [vmem:[#allocation10 + $0x1b0] sm:$0xff] }
 0x15d   :  { %v1055_v50 = vpack.c.bf16 %v572_v47, %v570_v46  ;;  %v691_v47 = vld [vmem:[#allocation11 + $0xc0] sm:$0xff] }
 0x15f   :  { %1016 = vmatpush1.bf16.msra.mxu1 %v1015_v52  ;;  %v284_v52 = vld [vmem:[%s1552_s4] sm:$0x3] }
 0x160   :  { %1018 = vmatprep.subr.bf16.mxu1 %v1017_v53  ;;  %v289_v53 = vrot.slane %v284_v52, %v1495_v7  ;;  %v293_v54 = vrot.slane %v284_v52, %v1500_v9 }
 0x163   :  { %1020 = vmatpush1.bf16.msra.mxu1 %v1019_v58 }
 0x164   :  { %1022 = vmatprep.subr.bf16.mxu1 %v1021_v59 }
 0x167   :  { %1024 = vmatpush1.bf16.msra.mxu1 %v1023_v0  ;;  %v579_v0 = vld [vmem:[#allocation10 + $0x1e8] sm:$0xff] }
 0x168   :  { %1026 = vmatprep.subr.bf16.mxu1 %v1025_v1  ;;  %v581_v1 = vld [vmem:[#allocation10 + $0x1f8] sm:$0xff] }
 0x169   :  { %v1061_v2 = vpack.c.bf16 %v581_v1, %v579_v0  ;;  %v1101_v0 = vpack.c.bf16 %v706_v62, %v704_v61  ;;  %v703_v1 = vld [vmem:[#allocation11 + $0x120] sm:$0xff] }
 0x16b   :  { %1028 = vmatpush1.bf16.msra.mxu1 %v1027_v6  ;;  %v668_v6 = vld [vmem:[#allocation11 + $0x8] sm:$0xff] }
 0x16c   :  { %1030 = vmatprep.subr.bf16.mxu1 %v1029_v8  ;;  %v670_v8 = vld [vmem:[#allocation11 + $0x18] sm:$0xff] }
 0x16d   :  { %v1065_v11 = vpack.c.bf16 %v670_v8, %v668_v6  ;;  %v1105_v6 = vpack.c.bf16 %v710_v4, %v708_v3  ;;  %v707_v8 = vld [vmem:[#allocation11 + $0x140] sm:$0xff] }
 0x16f   :  { %1032 = vmatpush1.bf16.msra.mxu1 %v1031_v14  ;;  %v674_v14 = vld [vmem:[#allocation11 + $0x38] sm:$0xff]  ;;  %1066 = vmatprep.subr.bf16.mxu0 %v1065_v11  ;;  %v712_v11 = vld [vmem:[#allocation11 + $0x168] sm:$0xff] }
 0x170   :  { %1034 = vmatprep.subr.bf16.mxu1 %v1033_v15  ;;  %v1067_v15 = vpack.c.bf16 %v669_v12, %v667_v10  ;;  %v1069_v16 = vpack.c.bf16 %v674_v14, %v672_v13  ;;  %v709_v10 = vld [vmem:[#allocation11 + $0x150] sm:$0xff]  ;;  %v714_v12 = vld [vmem:[#allocation11 + $0x178] sm:$0xff] }
 0x171   :  { %v1107_v13 = vpack.c.bf16 %v709_v10, %v707_v8  ;;  %v1109_v14 = vpack.c.bf16 %v714_v12, %v712_v11 }
 0x173   :  { %1036 = vmatpush1.bf16.msra.mxu1 %v1035_v20  ;;  %v678_v20 = vld [vmem:[#allocation11 + $0x58] sm:$0xff] }
 0x174   :  { %1038 = vmatprep.subr.bf16.mxu1 %v1037_v21  ;;  %v1071_v21 = vpack.c.bf16 %v673_v18, %v671_v17  ;;  %v1073_v22 = vpack.c.bf16 %v678_v20, %v676_v19  ;;  %v716_v17 = vld [vmem:[#allocation11 + $0x188] sm:$0xff]  ;;  %v718_v18 = vld [vmem:[#allocation11 + $0x198] sm:$0xff] }
 0x175   :  { %v1113_v20 = vpack.c.bf16 %v718_v18, %v716_v17 }
 0x177   :  { %1040 = vmatpush1.bf16.msra.mxu1 %v1039_v26  ;;  %v682_v26 = vld [vmem:[#allocation11 + $0x78] sm:$0xff] }
 0x178   :  { %1042 = vmatprep.subr.bf16.mxu1 %v1041_v27  ;;  %v1075_v27 = vpack.c.bf16 %v677_v24, %v675_v23  ;;  %v1077_v28 = vpack.c.bf16 %v682_v26, %v680_v25  ;;  %v720_v23 = vld [vmem:[#allocation11 + $0x1a8] sm:$0xff]  ;;  %v722_v24 = vld [vmem:[#allocation11 + $0x1b8] sm:$0xff] }
 0x179   :  { %v1117_v26 = vpack.c.bf16 %v722_v24, %v720_v23 }
 0x17b   :  { %1044 = vmatpush1.bf16.msra.mxu1 %v1043_v32  ;;  %v686_v32 = vld [vmem:[#allocation11 + $0x98] sm:$0xff] }
 0x17c   :  { %1046 = vmatprep.subr.bf16.mxu1 %v1045_v33  ;;  %v1079_v33 = vpack.c.bf16 %v681_v30, %v679_v29  ;;  %v1081_v34 = vpack.c.bf16 %v686_v32, %v684_v31  ;;  %v724_v29 = vld [vmem:[#allocation11 + $0x1c8] sm:$0xff]  ;;  %v726_v30 = vld [vmem:[#allocation11 + $0x1d8] sm:$0xff] }
 0x17d   :  { %v1121_v32 = vpack.c.bf16 %v726_v30, %v724_v29 }
 0x17f   :  { %1048 = vmatpush1.bf16.msra.mxu1 %v1047_v38  ;;  %v690_v38 = vld [vmem:[#allocation11 + $0xb8] sm:$0xff] }
 0x180   :  { %1050 = vmatprep.subr.bf16.mxu1 %v1049_v39  ;;  %v1083_v39 = vpack.c.bf16 %v685_v36, %v683_v35  ;;  %v1085_v40 = vpack.c.bf16 %v690_v38, %v688_v37 }
 0x183   :  { %1052 = vmatpush1.bf16.msra.mxu1 %v1051_v44  ;;  %v694_v44 = vld [vmem:[#allocation11 + $0xd8] sm:$0xff] }
 0x184   :  { %1054 = vmatprep.subr.bf16.mxu1 %v1053_v45  ;;  %v1087_v45 = vpack.c.bf16 %v689_v42, %v687_v41  ;;  %v1089_v46 = vpack.c.bf16 %v694_v44, %v692_v43  ;;  %v723_v42 = vld [vmem:[#allocation11 + $0x1c0] sm:$0xff]  ;;  %v725_v43 = vld [vmem:[#allocation11 + $0x1d0] sm:$0xff] }
 0x185   :  { %v1123_v44 = vpack.c.bf16 %v725_v43, %v723_v42 }
 0x187   :  { %1056 = vmatpush1.bf16.msra.mxu1 %v1055_v50  ;;  %v698_v50 = vld [vmem:[#allocation11 + $0xf8] sm:$0xff] }
 0x188   :  { %1058 = vmatprep.subr.bf16.mxu1 %v1057_v51  ;;  %v1091_v51 = vpack.c.bf16 %v693_v48, %v691_v47  ;;  %v1093_v52 = vpack.c.bf16 %v698_v50, %v696_v49  ;;  %v727_v48 = vld [vmem:[#allocation11 + $0x1e0] sm:$0xff]  ;;  %v729_v49 = vld [vmem:[#allocation11 + $0x1f0] sm:$0xff] }
 0x189   :  { %v1127_v50 = vpack.c.bf16 %v729_v49, %v727_v48 }
 0x18b   :  { %1060 = vmatpush1.bf16.msra.mxu1 %v1059_v63 }
 0x18c   :  { %1062 = vmatprep.subr.bf16.mxu1 %v1061_v2  ;;  %v705_v2 = vld [vmem:[#allocation11 + $0x130] sm:$0xff] }
 0x18f   :  { %1064 = vmatpush1.bf16.msra.mxu1 %v1063_v5  ;;  %v1103_v5 = vpack.c.bf16 %v705_v2, %v703_v1 }
 0x225   :  { %v362_v55 = vpop.f32.mrb[0].mxu1 }
 0x226   :  { %v363_v56 = vadd.f32 %v362_v55, %v289_v53  ;;  %v364_v57 = vpop.f32.mrb[1].mxu1  ;;  %v695_v53 = vld [vmem:[#allocation11 + $0xe0] sm:$0xff]  ;;  %v700_v55 = vld [vmem:[#allocation11 + $0x108] sm:$0xff] }
 0x227   :  { %v365_v58 = vadd.f32 %v364_v57, %v293_v54  ;;  %v697_v54 = vld [vmem:[#allocation11 + $0xf0] sm:$0xff] }
 0x228   :  { %v367_v60 = vmax.f32 %v363_v56, 0.0  ;;  %v702_v56 = vld [vmem:[#allocation11 + $0x118] sm:$0xff]  ;;  %v1095_v57 = vpack.c.bf16 %v697_v54, %v695_v53 }
 0x229   :  { %v368_v59 = vmax.f32 %v365_v58, 0.0  ;;  %v1097_v58 = vpack.c.bf16 %v702_v56, %v700_v55 }
 0x22b   :  { %509 = vmatprep.mubr.f32.mxu0 %v368_v59  ;;  %v699_v59 = vld [vmem:[#allocation11 + $0x100] sm:$0xff] }
 0x22c   :  { %510 = vmatmul.mubr.f32.vlgmr.msra.gmra.mrb[2].mxu0 %v367_v60  ;;  %v701_v60 = vld [vmem:[#allocation11 + $0x110] sm:$0xff] }
 0x22d   :  { %1068 = vmatpush1.bf16.msra.mxu0 %v1067_v15  ;;  %v1099_v63 = vpack.c.bf16 %v701_v60, %v699_v59  ;;  %v711_v15 = vld [vmem:[#allocation11 + $0x160] sm:$0xff]  ;;  %v731_v60 = vld [vmem:[%s1558_s10] sm:$0x3] }
 0x22e   :  { %1070 = vmatprep.subr.bf16.mxu0 %v1069_v16  ;;  %v713_v16 = vld [vmem:[#allocation11 + $0x170] sm:$0xff]  ;;  %v736_v61 = vrot.slane %v731_v60, %v1495_v7  ;;  %v740_v62 = vrot.slane %v731_v60, %v1500_v9 }
 0x22f   :  { %v1111_v19 = vpack.c.bf16 %v713_v16, %v711_v15 }
 0x231   :  { %1072 = vmatpush1.bf16.msra.mxu0 %v1071_v21  ;;  %v715_v21 = vld [vmem:[#allocation11 + $0x180] sm:$0xff] }
 0x232   :  { %1074 = vmatprep.subr.bf16.mxu0 %v1073_v22  ;;  %v717_v22 = vld [vmem:[#allocation11 + $0x190] sm:$0xff] }
 0x233   :  { %v1115_v25 = vpack.c.bf16 %v717_v22, %v715_v21 }
 0x235   :  { %1076 = vmatpush1.bf16.msra.mxu0 %v1075_v27  ;;  %v719_v27 = vld [vmem:[#allocation11 + $0x1a0] sm:$0xff] }
 0x236   :  { %1078 = vmatprep.subr.bf16.mxu0 %v1077_v28  ;;  %v721_v28 = vld [vmem:[#allocation11 + $0x1b0] sm:$0xff] }
 0x237   :  { %v1119_v31 = vpack.c.bf16 %v721_v28, %v719_v27 }
 0x239   :  { %1080 = vmatpush1.bf16.msra.mxu0 %v1079_v33  ;;  %v433_v33 = vld [vmem:[%s1554_s6] sm:$0x3] }
 0x23a   :  { %1082 = vmatprep.subr.bf16.mxu0 %v1081_v34  ;;  %v438_v34 = vrot.slane %v433_v33, %v1495_v7  ;;  %v442_v35 = vrot.slane %v433_v33, %v1500_v9 }
 0x23d   :  { %1084 = vmatpush1.bf16.msra.mxu0 %v1083_v39 }
 0x23e   :  { %1086 = vmatprep.subr.bf16.mxu0 %v1085_v40 }
 0x241   :  { %1088 = vmatpush1.bf16.msra.mxu0 %v1087_v45  ;;  %v728_v45 = vld [vmem:[#allocation11 + $0x1e8] sm:$0xff] }
 0x242   :  { %1090 = vmatprep.subr.bf16.mxu0 %v1089_v46  ;;  %v730_v46 = vld [vmem:[#allocation11 + $0x1f8] sm:$0xff] }
 0x243   :  { %v1125_v47 = vpack.c.bf16 %v730_v46, %v728_v45 }
 0x245   :  { %1092 = vmatpush1.bf16.msra.mxu0 %v1091_v51  ;;  %v582_v51 = vld [vmem:[%s1556_s8] sm:$0x3]  ;;  %s1341_s8 = smov [#allocation13]  }
 0x246   :  { %1094 = vmatprep.subr.bf16.mxu0 %v1093_v52  ;;  %v587_v52 = vrot.slane %v582_v51, %v1495_v7  ;;  %v591_v53 = vrot.slane %v582_v51, %v1500_v9  ;;  %s838_s25 = sshll.u32 %s1341_s8, 4  ;;  %s839_s25 = int_to_ptr.vmem [resolvable:$true] %s838_s25 }
 0x247   :  { %s1276_s27 = scalar_lea.vmem %s839_s25, 128  ;;  %p1281_p7 = scmp.lt.s32.totalorder %s839_s25, %s839_s25 }
 0x248   :  { %p1277_p6 = scmp.ne.s32.totalorder %s839_s25, %s1276_s27  ;;  %p1282_p8 = scmp.lt.s32.totalorder %s1276_s27, %s1276_s27 }
 0x249   :  { %1096 = vmatpush1.bf16.msra.mxu0 %v1095_v57 }
 0x24a   :  { %1098 = vmatprep.subr.bf16.mxu0 %v1097_v58  ;;  %p1283_p9 = por %p1282_p8, %p1281_p7 }
 0x24c   :  { %p1284_p10 = pnand %p1283_p9, %p1277_p6 }
 0x24d   :  { %1100 = vmatpush1.bf16.msra.mxu0 %v1099_v63 }
 0x24e   :  { %1102 = vmatprep.subr.bf16.mxu0 %v1101_v0 }
 0x251   :  { %1104 = vmatpush1.bf16.msra.mxu0 %v1103_v5 }
 0x252   :  { %1106 = vmatprep.subr.bf16.mxu0 %v1105_v6 }
 0x255   :  { %1108 = vmatpush1.bf16.msra.mxu0 %v1107_v13 }
 0x256   :  { %1110 = vmatprep.subr.bf16.mxu0 %v1109_v14 }
 0x259   :  { %1112 = vmatpush1.bf16.msra.mxu0 %v1111_v19 }
 0x25a   :  { %1114 = vmatprep.subr.bf16.mxu0 %v1113_v20 }
 0x25d   :  { %1116 = vmatpush1.bf16.msra.mxu0 %v1115_v25 }
 0x25e   :  { %1118 = vmatprep.subr.bf16.mxu0 %v1117_v26 }
 0x261   :  { %1120 = vmatpush1.bf16.msra.mxu0 %v1119_v31 }
 0x262   :  { %1122 = vmatprep.subr.bf16.mxu0 %v1121_v32 }
 0x265   :  { %1124 = vmatpush1.bf16.msra.mxu0 %v1123_v44 }
 0x266   :  { %1126 = vmatprep.subr.bf16.mxu0 %v1125_v47 }
 0x269   :  { %1128 = vmatpush1.bf16.msra.mxu0 %v1127_v50 }
 0x2ff   :  { %v511_v36 = vpop.f32.mrb[2].mxu0 }
 0x300   :  { %v512_v37 = vadd.f32 %v511_v36, %v438_v34  ;;  %v513_v38 = vpop.f32.mrb[3].mxu0 }
 0x301   :  { %v514_v39 = vadd.f32 %v513_v38, %v442_v35 }
 0x302   :  { %v516_v41 = vmax.f32 %v512_v37, 0.0 }
 0x303   :  { %v517_v40 = vmax.f32 %v514_v39, 0.0 }
 0x305   :  { %658 = vmatprep.mubr.f32.mxu1 %v517_v40 }
 0x306   :  { %659 = vmatmul.mubr.f32.vlgmr.msra.gmra.mrb[2].mxu1 %v516_v41 }
 0x3d9   :  { %v660_v54 = vpop.f32.mrb[2].mxu1 }
 0x3da   :  { %v661_v55 = vadd.f32 %v660_v54, %v587_v52  ;;  %v662_v56 = vpop.f32.mrb[3].mxu1 }
 0x3db   :  { %v663_v57 = vadd.f32 %v662_v56, %v591_v53 }
 0x3dc   :  { %v665_v59 = vmax.f32 %v661_v55, 0.0 }
 0x3dd   :  { %v666_v58 = vmax.f32 %v663_v57, 0.0 }
 0x3df   :  { %807 = vmatprep.mubr.f32.mxu0 %v666_v58 }
 0x3e0   :  { %808 = vmatmul.mubr.f32.vlgmr.msra.gmra.mrb[4].mxu0 %v665_v59 }
 0x4b3   :  { %v809_v63 = vpop.f32.mrb[4].mxu0 }
 0x4b4   :  { %v810_v0 = vadd.f32 %v809_v63, %v736_v61  ;;  %v811_v1 = vpop.f32.mrb[5].mxu0 }
 0x4b5   :  { %v812_v2 = vadd.f32 %v811_v1, %v740_v62 }
 0x4b6   :  { %814 = vst [vmem:[#allocation13] sm:$0xff] %v810_v0 }
 0x4b7   :  { %v816_v3 = vand.u32 2147483647, %v812_v2 }
 0x4b8   :  { %1287 = shalt.err (!%p1284_p10)
}
 0x4b9   :  { %s1288_s3 = scalar_lea.hbm %s1559_s11, 128 }
 0x4ba   :  { %p1289_p11 = scmp.ne.s32.totalorder %s1559_s11, %s1288_s3  ;;  %p1292_p12 = scmp.lt.u32.totalorder %s1288_s3, %s1559_s11 }
 0x4bc   :  { %p1294_p13 = pnand %p1292_p12, %p1289_p11 }
 0x4be   :  { %1297 = shalt.err (!%p1294_p13)
}
 0x4bf   :  { %841 = dma.vmem_to_hbm [thread:$0]  %s839_s25, 128, %s1559_s11, [#allocation4]   ;;  %v817_v7 = vsub.f32 0.0, %v816_v3  ;;  %v815_v14 = vmax.f32 %v812_v2, 0.0 }
 0x4c0   :  { %s1342_s17 = smov [#allocation14]  }
 0x4c1   :  { %v818_v9 = vmul.f32 1.442695, %v817_v7  ;;  %s848_s0 = sshll.u32 %s1342_s17, 4  ;;  %s849_s0 = int_to_ptr.vmem [resolvable:$true] %s848_s0 }
 0x4c2   :  { %s1298_s11 = scalar_lea.vmem %s849_s0, 128  ;;  %p1303_p1 = scmp.lt.s32.totalorder %s849_s0, %s849_s0 }
 0x4c3   :  { %1140 = vpow2.f32 %v818_v9  ;;  %p1299_p0 = scmp.ne.s32.totalorder %s849_s0, %s1298_s11  ;;  %p1304_p2 = scmp.lt.s32.totalorder %s1298_s11, %s1298_s11 }
 0x4c5   :  { %p1305_p3 = por %p1304_p2, %p1303_p1 }
 0x4c7   :  { %p1306_p4 = pnand %p1305_p3, %p1299_p0 }
 0x4cd   :  { %v1141_v4 = vpop.eup %1140 }
 0x4ce   :  { %v820_v5 = vadd.f32 1.0, %v1141_v4  ;;  %v823_v6 = vmul.f32 -0.5, %v1141_v4  ;;  %v826_v10 = vand.u32 2147483647, %v1141_v4 }
 0x4d0   :  { %1142 = vlog2.f32 %v820_v5  ;;  %v824_v8 = vadd.f32 1.0, %v823_v6  ;;  %vm827_vm1 = vcmp.lt.f32.partialorder %v826_v10, 0.0004427343 }
 0x4d2   :  { %v825_v13 = vmul.f32 %v1141_v4, %v824_v8 }
 0x4da   :  { %v1143_v11 = vpop.eup %1142 }
 0x4db   :  { %v822_v12 = vmul.f32 0.6931472, %v1143_v11 }
 0x4dd   :  { %v828_v15 = vsel %vm827_vm1, %v825_v13, %v822_v12 }
 0x4de   :  { %v829_v16 = vadd.f32 %v828_v15, %v815_v14 }
 0x4e0   :  { %v830_v17 = vadd.f32 0.0001, %v829_v16 }
 0x4e2   :  { %831 = vst [vmem:[#allocation14] sm:$0xff] %v830_v17 }
 0x4e3   :  { %1309 = shalt.err (!%p1306_p4)
}
 0x4e4   :  { %s1310_s21 = scalar_lea.hbm %s1560_s12, 128 }
 0x4e5   :  { %p1311_p5 = scmp.ne.s32.totalorder %s1560_s12, %s1310_s21  ;;  %p1314_p6 = scmp.lt.u32.totalorder %s1310_s21, %s1560_s12 }
 0x4e7   :  { %p1316_p7 = pnand %p1314_p6, %p1311_p5 }
 0x4e9   :  { %1319 = shalt.err (!%p1316_p7)
}
 0x4ea   :  { %851 = dma.vmem_to_hbm [thread:$0]  %s849_s0, 128, %s1560_s12, [#allocation15]  }
 0x4eb   :  { %1328 = dma.done.wait [#allocation4], 128  }
 0x4ec   :  { %1329 = vsyncadd [#allocation4], 4294967168 }
 0x4ed   :  { %1330 = dma.done.wait [#allocation15], 128  }
 0x4ee   :  { %1331 = vsyncadd [#allocation15], 4294967168 }
 0x4ef   :  { %858 = vsyncpa [#allocation3], 1 }
 0x4f0   :  { %859 = vsyncpa [#allocation6], 1 }
 0x4f1   :  { %860 = vsyncpa [#allocation9], 1 }
 0x4f2   :  { %861 = vsyncpa [#allocation12], 1 }
 0x4f3   :  { %862 = vsyncpa [#allocation4], 1 }
 0x4f4   :  { %863 = vsyncpa [#allocation15], 1 }

</bundles_post_ra>
